<compile_context>
chip_gen: v5e
topology: v5e:2x2
jax: 0.10.0
libtpu: 0.0.40
codegen_flags: <defaults>
</compile_context>

<pallas_src>
import functools
import math

import jax
import jax.numpy as jnp
from jax.experimental import pallas as pl
from jax.experimental.pallas import tpu as pltpu


def _flash_attn_kernel(vl_ref, q_ref, k_ref, v_ref, o_ref,
                       m_sc, l_sc, acc_sc, *, scale, tk):
    b = pl.program_id(0)
    kt = pl.program_id(2)
    nk = pl.num_programs(2)

    # init online-softmax state at the first K tile of every (batch, q-tile)
    @pl.when(kt == 0)
    def _init():
        m_sc[...] = jnp.full_like(m_sc, -jnp.inf)
        l_sc[...] = jnp.zeros_like(l_sc)
        acc_sc[...] = jnp.zeros_like(acc_sc)

    vl = vl_ref[b]                 # scalar int32 from SMEM (scalar prefetch)
    k_start = kt * tk

    # Skip K tiles that are entirely masked (k_start >= valid_len): their
    # softmax weights underflow to exactly 0, so skipping saves both the MXU
    # work and lets the reference match bit-for-bit.  Exception: valid_len<=0
    # degenerates (like the PyTorch reference) to uniform attention over ALL
    # K positions, so then every tile must still contribute its exp(0)=1 rows.
    @pl.when(jnp.logical_or(k_start < vl, vl <= 0))
    def _update():
        # Fold 1/sqrt(d) into q: tq*D multiplies instead of tq*tk on scores.
        q = q_ref[0] * scale                               # (tq, D)
        k = k_ref[0]                                       # (tk, D)
        v = v_ref[0]                                       # (tk, Dv)

        # scores = q @ k^T -- contract over D directly on the MXU, no k.T copy
        s = jax.lax.dot_general(
            q, k, dimension_numbers=(((1,), (1,)), ((), ())),
            preferred_element_type=jnp.float32)            # (tq, tk) f32

        # masked_softmax semantics: positions >= valid_len get -1e6
        col = jax.lax.broadcasted_iota(jnp.int32, s.shape, 1) + k_start
        s = jnp.where(col < vl, s, jnp.float32(-1000000.0))

        # online softmax update (all state in f32)
        m_prev = m_sc[...]
        m_new = jnp.maximum(m_prev, jnp.max(s, axis=-1, keepdims=True))
        alpha = jnp.exp(m_prev - m_new)
        p = jnp.exp(s - m_new)
        l_sc[...] = alpha * l_sc[...] + jnp.sum(p, axis=-1, keepdims=True)
        acc_sc[...] = alpha * acc_sc[...] + jax.lax.dot_general(
            p.astype(v.dtype), v,
            dimension_numbers=(((1,), (0,)), ((), ())),
            preferred_element_type=jnp.float32)
        m_sc[...] = m_new

    # finalize: normalize and emit the output tile once per (batch, q-tile)
    @pl.when(kt == nk - 1)
    def _finalize():
        inv_l = pl.reciprocal(l_sc[...], approx=True)      # EUP slot, ~free
        o_ref[0] = (acc_sc[...] * inv_l).astype(o_ref.dtype)


def _pick_tile(n, cap):
    """Largest multiple-of-8 divisor of n that is <= cap, else n (full axis)."""
    if n <= cap:
        return n
    t = (cap // 8) * 8
    while t >= 8:
        if n % t == 0:
            return t
        t -= 8
    return n


def dot_product_attention(queries, keys, values, valid_lens=None,
                          *, tq_cap=256, tk_cap=512):
    """Pallas TPU implementation of DotProductAttention.forward (eval mode)."""
    B, Q, D = queries.shape
    _, K, _ = keys.shape
    Dv = values.shape[-1]

    if valid_lens is None:
        valid_lens = jnp.full((B,), K, dtype=jnp.int32)   # no masking
    valid_lens = valid_lens.astype(jnp.int32)

    # Tile sizes: multiples of 8 (sublane rule); caps sized so the double-
    # buffered q/k/v tiles + f32 scratch stay well inside the 16/32 MiB scoped
    # VMEM defaults on v5e/v6e/v7x.
    tq = _pick_tile(Q, tq_cap)
    tk = _pick_tile(K, tk_cap)
    scale = 1.0 / math.sqrt(D)

    kernel = functools.partial(_flash_attn_kernel, scale=scale, tk=tk)

    grid_spec = pltpu.PrefetchScalarGridSpec(
        num_scalar_prefetch=1,                 # valid_lens lands in SMEM
        grid=(B, Q // tq, K // tk),            # K (reduction) axis last
        in_specs=[
            pl.BlockSpec((1, tq, D), lambda b, qi, ki, vl: (b, qi, 0)),   # q
            pl.BlockSpec((1, tk, D), lambda b, qi, ki, vl: (b, ki, 0)),   # k
            pl.BlockSpec((1, tk, Dv), lambda b, qi, ki, vl: (b, ki, 0)),  # v
        ],
        out_specs=pl.BlockSpec((1, tq, Dv), lambda b, qi, ki, vl: (b, qi, 0)),
        scratch_shapes=[
            pltpu.VMEM((tq, 1), jnp.float32),    # m (running max)
            pltpu.VMEM((tq, 1), jnp.float32),    # l (running denom)
            pltpu.VMEM((tq, Dv), jnp.float32),   # acc (unnormalized output)
        ],
    )

    return pl.pallas_call(
        kernel,
        out_shape=jax.ShapeDtypeStruct((B, Q, Dv), queries.dtype),
        grid_spec=grid_spec,
        compiler_params=pltpu.CompilerParams(
            dimension_semantics=("parallel", "parallel", "arbitrary")),
    )(valid_lens, queries, keys, values)


def _reference(queries, keys, values, valid_lens):
    """Pure-JAX reference mirroring the PyTorch module (eval mode)."""
    d = queries.shape[-1]
    scores = jnp.einsum("bqd,bkd->bqk", queries, keys) / math.sqrt(d)
    if valid_lens is not None:
        col = jnp.arange(scores.shape[-1])[None, None, :]
        mask = col < valid_lens[:, None, None]
        scores = jnp.where(mask, scores, -1000000.0)
    attn = jax.nn.softmax(scores, axis=-1)
    return jnp.einsum("bqk,bkv->bqv", attn, values)


if __name__ == "__main__":
    key = jax.random.PRNGKey(0)
    kq, kk, kv, kq2, kk2, kv2 = jax.random.split(key, 6)

    # tolerance is loosened slightly because the softmax denominator uses the
    # EUP approximate reciprocal (pl.reciprocal(approx=True)).
    TOL = dict(atol=1e-2, rtol=1e-2)

    # --- test 1: small shapes consistent with the module's forward ----------
    B, Q, K, D, Dv = 2, 8, 8, 32, 32
    queries = jax.random.normal(kq, (B, Q, D), dtype=jnp.float32)
    keys = jax.random.normal(kk, (B, K, D), dtype=jnp.float32)
    values = jax.random.normal(kv, (B, K, Dv), dtype=jnp.float32)
    valid_lens = jnp.array([3, 6], dtype=jnp.int32)

    out = jax.block_until_ready(dot_product_attention(queries, keys, values, valid_lens))
    ref = _reference(queries, keys, values, valid_lens)
    assert out.shape == (B, Q, Dv)
    assert jnp.allclose(out, ref, **TOL), "mismatch vs reference (masked)"

    # --- test 2: valid_lens=None path ---------------------------------------
    out2 = jax.block_until_ready(dot_product_attention(queries, keys, values, None))
    ref2 = _reference(queries, keys, values, None)
    assert jnp.allclose(out2, ref2, **TOL), "mismatch (no mask)"

    # --- test 3: multi-K-tile path (exercises online softmax + tile skip) ---
    B3, Q3, K3 = 2, 16, 1024
    q3 = jax.random.normal(kq2, (B3, Q3, D), dtype=jnp.float32)
    k3 = jax.random.normal(kk2, (B3, K3, D), dtype=jnp.float32)
    v3 = jax.random.normal(kv2, (B3, K3, Dv), dtype=jnp.float32)
    vl3 = jnp.array([0, 700], dtype=jnp.int32)   # includes the degenerate vl=0 case

    out3 = jax.block_until_ready(dot_product_attention(q3, k3, v3, vl3))
    ref3 = _reference(q3, k3, v3, vl3)
    assert jnp.allclose(out3, ref3, **TOL), "mismatch vs reference (tiled K)"

    # TODO(synk): dropout is identity (eval mode); 2-D per-query valid_lens and
    # exposing attention_weights are not implemented in the kernel.
    print("KERNEL_OK")
</pallas_src>

<mosaic_0001>
module attributes {stable_mosaic.version = 11 : i64} {
  func.func @_flash_attn_kernel(%arg0: i32, %arg1: i32, %arg2: i32, %arg3: memref<2xi32, #tpu.memory_space<smem>>, %arg4: memref<1x8x32xf32, #tpu.memory_space<vmem>>, %arg5: memref<1x8x32xf32, #tpu.memory_space<vmem>>, %arg6: memref<1x8x32xf32, #tpu.memory_space<vmem>>, %arg7: memref<1x8x32xf32, #tpu.memory_space<vmem>>, %arg8: memref<8x1xf32, #tpu.memory_space<vmem>>, %arg9: memref<8x1xf32, #tpu.memory_space<vmem>>, %arg10: memref<8x32xf32, #tpu.memory_space<vmem>>) attributes {dimension_semantics = [#tpu.dimension_semantics<parallel>, #tpu.dimension_semantics<parallel>, #tpu.dimension_semantics<arbitrary>], iteration_bounds = array<i64: 2, 1, 1>, scalar_prefetch = 1 : i64, scratch_operands = 3 : i64, tpu.core_type = #tpu.core_type<tc>, window_params = [{transform_indices = @transform_0, window_bounds = array<i64: 1, 8, 32>}, {transform_indices = @transform_1, window_bounds = array<i64: 1, 8, 32>}, {transform_indices = @transform_2, window_bounds = array<i64: 1, 8, 32>}, {transform_indices = @transform_3, window_bounds = array<i64: 1, 8, 32>}]} {
    %c0_i32 = arith.constant 0 : i32
    %0 = arith.cmpi eq, %arg2, %c0_i32 : i32
    %1 = arith.extui %0 : i1 to i32
    %c0_i32_0 = arith.constant 0 : i32
    %2 = arith.cmpi ne, %1, %c0_i32_0 : i32
    scf.if %2 {
      %cst = arith.constant 0xFF800000 : f32
      %14 = vector.broadcast %cst : f32 to vector<8x1xf32>
      %c0 = arith.constant 0 : index
      %c0_5 = arith.constant 0 : index
      %15 = vector.load %arg8[%c0, %c0_5] : memref<8x1xf32, #tpu.memory_space<vmem>>, vector<8x1xf32>
      tpu.vector_store %arg8[%c0, %c0_5], %14 {strides = array<i32>} : memref<8x1xf32, #tpu.memory_space<vmem>>, vector<8x1xf32>,
      %cst_6 = arith.constant 0.000000e+00 : f32
      %16 = vector.broadcast %cst_6 : f32 to vector<8x1xf32>
      %c0_7 = arith.constant 0 : index
      %c0_8 = arith.constant 0 : index
      %17 = vector.load %arg9[%c0_7, %c0_8] : memref<8x1xf32, #tpu.memory_space<vmem>>, vector<8x1xf32>
      tpu.vector_store %arg9[%c0_7, %c0_8], %16 {strides = array<i32>} : memref<8x1xf32, #tpu.memory_space<vmem>>, vector<8x1xf32>,
      %cst_9 = arith.constant 0.000000e+00 : f32
      %18 = vector.broadcast %cst_9 : f32 to vector<8x32xf32>
      %c0_10 = arith.constant 0 : index
      %c0_11 = arith.constant 0 : index
      %19 = vector.load %arg10[%c0_10, %c0_11] : memref<8x32xf32, #tpu.memory_space<vmem>>, vector<8x32xf32>
      tpu.vector_store %arg10[%c0_10, %c0_11], %18 {strides = array<i32>} : memref<8x32xf32, #tpu.memory_space<vmem>>, vector<8x32xf32>,
    } else {
    }
    %3 = arith.index_cast %arg0 : i32 to index
    %4 = memref.load %arg3[%3] : memref<2xi32, #tpu.memory_space<smem>>
    %c8_i32 = arith.constant 8 : i32
    %5 = arith.muli %arg2, %c8_i32 : i32
    %6 = arith.cmpi slt, %5, %4 : i32
    %c0_i32_1 = arith.constant 0 : i32
    %7 = arith.cmpi sle, %4, %c0_i32_1 : i32
    %8 = arith.ori %6, %7 : i1
    %9 = arith.extui %8 : i1 to i32
    %c0_i32_2 = arith.constant 0 : i32
    %10 = arith.cmpi ne, %9, %c0_i32_2 : i32
    scf.if %10 {
      %c0 = arith.constant 0 : index
      %c0_5 = arith.constant 0 : index
      %c0_6 = arith.constant 0 : index
      %14 = vector.load %arg4[%c0, %c0_5, %c0_6] : memref<1x8x32xf32, #tpu.memory_space<vmem>>, vector<1x8x32xf32>
      %15 = vector.shape_cast %14 : vector<1x8x32xf32> to vector<8x32xf32>
      %cst = arith.constant 0.176776692 : f32
      %16 = vector.broadcast %cst : f32 to vector<8x32xf32>
      %17 = arith.mulf %15, %16 : vector<8x32xf32>
      %c0_7 = arith.constant 0 : index
      %c0_8 = arith.constant 0 : index
      %c0_9 = arith.constant 0 : index
      %18 = vector.load %arg5[%c0_7, %c0_8, %c0_9] : memref<1x8x32xf32, #tpu.memory_space<vmem>>, vector<1x8x32xf32>
      %19 = vector.shape_cast %18 : vector<1x8x32xf32> to vector<8x32xf32>
      %c0_10 = arith.constant 0 : index
      %c0_11 = arith.constant 0 : index
      %c0_12 = arith.constant 0 : index
      %20 = vector.load %arg6[%c0_10, %c0_11, %c0_12] : memref<1x8x32xf32, #tpu.memory_space<vmem>>, vector<1x8x32xf32>
      %21 = vector.shape_cast %20 : vector<1x8x32xf32> to vector<8x32xf32>
      %cst_13 = arith.constant dense<0.000000e+00> : vector<8x8xf32>
      %22 = tpu.matmul %17, %19, %cst_13 {dimension_numbers = #tpu.dot_dimension_numbers<[1], [1], [0], [0], [0, 0, 1, 0], [], []>} : vector<8x32xf32>, vector<8x32xf32>, vector<8x8xf32> -> vector<8x8xf32>
      %23 = tpu.iota {dimensions = array<i32: 1>} : vector<8x8xi32>
      %24 = vector.broadcast %5 : i32 to vector<8x8xi32>
      %25 = arith.addi %23, %24 : vector<8x8xi32>
      %26 = vector.broadcast %4 : i32 to vector<8x8xi32>
      %27 = arith.cmpi slt, %25, %26 : vector<8x8xi32>
      %cst_14 = arith.constant -1.000000e+06 : f32
      %28 = vector.broadcast %cst_14 : f32 to vector<8x8xf32>
      %29 = arith.select %27, %22, %28 : vector<8x8xi1>, vector<8x8xf32>
      %c0_15 = arith.constant 0 : index
      %c0_16 = arith.constant 0 : index
      %30 = vector.load %arg8[%c0_15, %c0_16] : memref<8x1xf32, #tpu.memory_space<vmem>>, vector<8x1xf32>
      %cst_17 = arith.constant dense<0xFF800000> : vector<8xf32>
      %31 = vector.multi_reduction <maximumf>, %29, %cst_17 [1] : vector<8x8xf32> to vector<8xf32>
      %32 = vector.shape_cast %31 : vector<8xf32> to vector<8x1xf32>
      %33 = arith.maximumf %30, %32 : vector<8x1xf32>
      %34 = arith.subf %30, %33 : vector<8x1xf32>
      %35 = math.exp %34 : vector<8x1xf32>
      %36 = vector.broadcast %33 : vector<8x1xf32> to vector<8x8xf32>
      %37 = arith.subf %29, %36 : vector<8x8xf32>
      %38 = math.exp %37 : vector<8x8xf32>
      %c0_18 = arith.constant 0 : index
      %c0_19 = arith.constant 0 : index
      %39 = vector.load %arg9[%c0_18, %c0_19] : memref<8x1xf32, #tpu.memory_space<vmem>>, vector<8x1xf32>
      %40 = arith.mulf %35, %39 : vector<8x1xf32>
      %cst_20 = arith.constant dense<0.000000e+00> : vector<8xf32>
      %41 = vector.multi_reduction <add>, %38, %cst_20 [1] : vector<8x8xf32> to vector<8xf32>
      %42 = vector.shape_cast %41 : vector<8xf32> to vector<8x1xf32>
      %43 = arith.addf %40, %42 : vector<8x1xf32>
      %c0_21 = arith.constant 0 : index
      %c0_22 = arith.constant 0 : index
      %44 = vector.load %arg9[%c0_21, %c0_22] : memref<8x1xf32, #tpu.memory_space<vmem>>, vector<8x1xf32>
      tpu.vector_store %arg9[%c0_21, %c0_22], %43 {strides = array<i32>} : memref<8x1xf32, #tpu.memory_space<vmem>>, vector<8x1xf32>,
      %c0_23 = arith.constant 0 : index
      %c0_24 = arith.constant 0 : index
      %45 = vector.load %arg10[%c0_23, %c0_24] : memref<8x32xf32, #tpu.memory_space<vmem>>, vector<8x32xf32>
      %46 = vector.broadcast %35 : vector<8x1xf32> to vector<8x32xf32>
      %47 = arith.mulf %46, %45 : vector<8x32xf32>
      %cst_25 = arith.constant dense<0.000000e+00> : vector<8x32xf32>
      %48 = tpu.matmul %38, %21, %cst_25 {dimension_numbers = #tpu.dot_dimension_numbers<[1], [0], [0], [1], [0, 0, 1, 1], [], []>} : vector<8x8xf32>, vector<8x32xf32>, vector<8x32xf32> -> vector<8x32xf32>
      %49 = arith.addf %47, %48 : vector<8x32xf32>
      %c0_26 = arith.constant 0 : index
      %c0_27 = arith.constant 0 : index
      %50 = vector.load %arg10[%c0_26, %c0_27] : memref<8x32xf32, #tpu.memory_space<vmem>>, vector<8x32xf32>
      tpu.vector_store %arg10[%c0_26, %c0_27], %49 {strides = array<i32>} : memref<8x32xf32, #tpu.memory_space<vmem>>, vector<8x32xf32>,
      %c0_28 = arith.constant 0 : index
      %c0_29 = arith.constant 0 : index
      %51 = vector.load %arg8[%c0_28, %c0_29] : memref<8x1xf32, #tpu.memory_space<vmem>>, vector<8x1xf32>
      tpu.vector_store %arg8[%c0_28, %c0_29], %33 {strides = array<i32>} : memref<8x1xf32, #tpu.memory_space<vmem>>, vector<8x1xf32>,
    } else {
    }
    %c0_i32_3 = arith.constant 0 : i32
    %11 = arith.cmpi eq, %arg2, %c0_i32_3 : i32
    %12 = arith.extui %11 : i1 to i32
    %c0_i32_4 = arith.constant 0 : i32
    %13 = arith.cmpi ne, %12, %c0_i32_4 : i32
    scf.if %13 {
      %c0 = arith.constant 0 : index
      %c0_5 = arith.constant 0 : index
      %14 = vector.load %arg9[%c0, %c0_5] : memref<8x1xf32, #tpu.memory_space<vmem>>, vector<8x1xf32>
      %15 = tpu.reciprocal %14 {approx = true} : vector<8x1xf32> -> vector<8x1xf32>
      %c0_6 = arith.constant 0 : index
      %c0_7 = arith.constant 0 : index
      %16 = vector.load %arg10[%c0_6, %c0_7] : memref<8x32xf32, #tpu.memory_space<vmem>>, vector<8x32xf32>
      %17 = vector.broadcast %15 : vector<8x1xf32> to vector<8x32xf32>
      %18 = arith.mulf %16, %17 : vector<8x32xf32>
      %c0_8 = arith.constant 0 : index
      %c0_9 = arith.constant 0 : index
      %c0_10 = arith.constant 0 : index
      %19 = vector.load %arg7[%c0_8, %c0_9, %c0_10] : memref<1x8x32xf32, #tpu.memory_space<vmem>>, vector<1x8x32xf32>
      %20 = vector.shape_cast %19 : vector<1x8x32xf32> to vector<8x32xf32>
      %21 = vector.shape_cast %18 : vector<8x32xf32> to vector<1x8x32xf32>
      tpu.vector_store %arg7[%c0_8, %c0_9, %c0_10], %21 {strides = array<i32>} : memref<1x8x32xf32, #tpu.memory_space<vmem>>, vector<1x8x32xf32>,
    } else {
    }
    return
  }
  func.func @transform_0(%arg0: i32, %arg1: i32, %arg2: i32, %arg3: memref<2xi32, #tpu.memory_space<smem>>) -> (i32, i32, i32) {
    %c0_i32 = arith.constant 0 : i32
    %c0_i32_0 = arith.constant 0 : i32
    return %arg0, %arg1, %c0_i32 : i32, i32, i32
  }
  func.func @transform_1(%arg0: i32, %arg1: i32, %arg2: i32, %arg3: memref<2xi32, #tpu.memory_space<smem>>) -> (i32, i32, i32) {
    %c0_i32 = arith.constant 0 : i32
    %c0_i32_0 = arith.constant 0 : i32
    return %arg0, %arg2, %c0_i32 : i32, i32, i32
  }
  func.func @transform_2(%arg0: i32, %arg1: i32, %arg2: i32, %arg3: memref<2xi32, #tpu.memory_space<smem>>) -> (i32, i32, i32) {
    %c0_i32 = arith.constant 0 : i32
    %c0_i32_0 = arith.constant 0 : i32
    return %arg0, %arg2, %c0_i32 : i32, i32, i32
  }
  func.func @transform_3(%arg0: i32, %arg1: i32, %arg2: i32, %arg3: memref<2xi32, #tpu.memory_space<smem>>) -> (i32, i32, i32) {
    %c0_i32 = arith.constant 0 : i32
    %c0_i32_0 = arith.constant 0 : i32
    return %arg0, %arg1, %c0_i32 : i32, i32, i32
  }
}

</mosaic_0001>

<bundles_post_ra>
// kernel: tpu_custom_call.1
= control target key start
LH: loop header
LB: loop body
LE: loop exit
PB: predicated region body
PF: predicated region fallthrough
CT: control target
= control target key end

     0   :  { %s875_s18 = smov [#allocation6]   ;;  %s1083_s0 = inlined_call_operand.hbm [shape: s32[2], index: 0, kind: input, shape index: {}]   ;;  %s1084_s1 = inlined_call_operand.hbm [shape: f32[2,8,32], index: 1, kind: input, shape index: {}]   ;;  %s1085_s2 = inlined_call_operand.hbm [shape: f32[2,8,32], index: 2, kind: input, shape index: {}]   ;;  %s1086_s3 = inlined_call_operand.hbm [shape: f32[2,8,32], index: 3, kind: input, shape index: {}]   ;;  %s1087_s4 = inlined_call_operand.hbm [shape: f32[2,8,32], index: 4, kind: output, shape index: {}]  }
   0x1   :  { %1090 = sst [smem:[#allocation21_spill]] %s1085_s2  ;;  %s10_s17 = sshll.u32 %s1083_s0, 4  ;;  %s11_s17 = int_to_ptr.hbm [resolvable:$true] %s10_s17 }
   0x2   :  { %13 = dma.hbm_to_smem %s11_s17, 16, %s875_s18, [#allocation5] }
   0x3   :  { %837 = dma.done.wait [#allocation5], 16 }
   0x4   :  { %838 = vsyncadd [#allocation5], 4294967280 }
   0x5   :  { %16 = sfence }
   0x6   :  { %17 = vsyncpa [#allocation8], 0 }
   0x7   :  { %19 = vsyncpa [#allocation8 + $0x1], 0 }
   0x8   :  { %20 = vsyncpa [#allocation11], 0 }
   0x9   :  { %22 = vsyncpa [#allocation11 + $0x1], 0 }
   0xa   :  { %23 = vsyncpa [#allocation9], 0 }
   0xb   :  { %25 = vsyncpa [#allocation9 + $0x1], 0  ;;  %s908_s19 = smov 0   ;;  %s910_s20 = smov 0  }
   0xc   :  { %s912_s21 = smov 0   ;;  %s914_s22 = smov 0  }
   0xd   :  { %s916_s0 = smov 0   ;;  %s918_s23 = smov 0  }
   0xe LB: > { %1091 = sst [smem:[#allocation18_spill]] %s869_s0  ;;  %s939_s24 = sadd.s32 4294967295, %s873_s23   ;;  %s873_s23 = sphi %s918_s23, %s31_s23   ;;  %s869_s0 = sphi %s916_s0, %s1107_s0   ;;  %s865_s22 = sphi %s914_s22, %s1102_s22   ;;  %s861_s21 = sphi %s912_s21, %s1106_s21   ;;  %s857_s20 = sphi %s910_s20, %s1105_s20   ;;  %s853_s19 = sphi %s908_s19, %s1104_s19  }
   0xf   : > { %s575_s25 = sadd.s32 4294967294, %s873_s23   ;;  %s50_s26 = sadd.s32 1, %s869_s0 }
  0x10   : > { %s59_s27 = sadd.s32 1, %s861_s21  ;;  %p52_p0 = scmp.ge.s32.totalorder %s50_s26, 2 }
  0x11   : > { %p66_p1 = scmp.ne.s32.totalorder %s861_s21, %s857_s20  ;;  %p67_p2 = scmp.eq.s32.totalorder %s873_s23, 0 }
  0x12   : > { %p72_p3 = scmp.ne.s32.totalorder %s857_s20, %s853_s19  ;;  %s1109_s26 = smov (%p52_p0, %s50_s26), 0 }
  0x13   : > { %1092 = sst [smem:[#allocation19_spill]] %s1109_s26  ;;  %p951_p4 = por %p67_p2, %p66_p1 }
  0x14   : > { %p73_p5 = scmp.eq.s32.totalorder %s939_s24, 0  ;;  %s54_s29 = ssub.s32 %s869_s0, %s1109_s26 }
  0x15   : > { %p154_p6 = scmp.eq.s32.totalorder %s939_s24, 1  ;;  %p57_p7 = scmp.eq.s32.totalorder %s54_s29, 0 }
  0x16   : > { %p959_p8 = por %p73_p5, %p72_p3  ;;  %p160_p10 = scmp.eq.s32.totalorder %s575_s25, 1 }
  0x17   : > { %p963_p9 = por %p154_p6, %p66_p1  ;;  %p577_p12 = scmp.ge.s32.totalorder %s873_s23, 2 }
  0x18   : > { %s968_s6 = scalar_select %p57_p7, %s861_s21, %s59_s27  }
  0x19   : > { %p970_p11 = por %p160_p10, %p72_p3  ;;  %p619_p13 = scmp.lt.s32.totalorder %s873_s23, 2 }
  0x1a   : > { %1096 = sst [smem:[#allocation20_spill]] %s968_s6  ;;  %s180_s8 = sand.u32 1, %s861_s21  }
  0x1b   : > { %s578_s9 = sshll.u32 %s180_s8, 3  ;;  %s579_s10 = sshll.u32 %s869_s0, 3 }
  0x1c   : > { %p980_p0 = pnand %p619_p13, %p951_p4  ;;  %s200_s12 = sand.u32 1, %s873_s23  }
  0x1d   : > { %s1099_s2 = sld [smem:[#allocation21_spill]]  ;;  %s204_s17 = scalar_lea.vmem [#allocation10], %s578_s9 }
  0x1e   : > { %s213_s18 = sshll.u32 %s204_s17, 4  ;;  %s201_s25 = scalar_lea.sflag [#allocation11], %s200_s12  ;;  %s214_s18 = int_to_ptr.vmem [resolvable:$true] %s213_s18 }
  0x1f   : > { %p584_p1 = scmp.ge.s32.totalorder %s873_s23, 1  ;;  %p238_p2 = scmp.lt.s32.totalorder %s873_s23, 3 }
  0x20   : > { %s189_s13 = scalar_lea.hbm %s1084_s1, %s579_s10  ;;  %s181_s17 = scalar_lea.sflag [#allocation8], %s180_s8 }
  0x21   : > { %p992_p3 = pnand %p584_p1, %p238_p2  ;;  %s191_s14 = sshll.u32 %s189_s13, 4  ;;  %s192_s14 = int_to_ptr.hbm [resolvable:$true] %s191_s14 }
  0x22   : > { %s224_s0 = scalar_lea.vmem [#allocation12], %s578_s9  ;;  %s1009_s28 = sand.u32 (!%p992_p3), 1, %s857_s20  }
  0x23   : > { %s209_s15 = scalar_lea.hbm %s1099_s2, %s579_s10  ;;  %s233_s6 = sshll.u32 %s224_s0, 4  ;;  %s234_s6 = int_to_ptr.vmem [resolvable:$true] %s233_s6 }
  0x24   : > { %s211_s16 = sshll.u32 %s209_s15, 4  ;;  %s184_s15 = scalar_lea.vmem [#allocation7], %s578_s9  ;;  %s212_s16 = int_to_ptr.hbm [resolvable:$true] %s211_s16 }
  0x25   : > { %611 = dma.hbm_to_vmem [thread:$0]  (!%p980_p0), %s212_s16, 128, %s214_s18, %s201_s25  }
  0x26   : > { %s193_s2 = sshll.u32 %s184_s15, 4  ;;  %s229_s18 = scalar_lea.hbm %s1086_s3, %s579_s10  ;;  %s194_s2 = int_to_ptr.vmem [resolvable:$true] %s193_s2 }
  0x27   : > { %608 = dma.hbm_to_vmem [thread:$0]  (!%p980_p0), %s192_s14, 128, %s194_s2, %s181_s17  }
  0x28   : > { %s231_s26 = sshll.u32 %s229_s18, 4  ;;  %242 = sbr.rel (%p992_p3) target bundleno = 691 (0x2b3), region = 32  ;;  %s232_s26 = int_to_ptr.hbm [resolvable:$true] %s231_s26 }
  0x29   : > { %614 = dma.hbm_to_vmem [thread:$0]  (!%p980_p0), %s232_s26, 128, %s234_s6, %s201_s25  }
  0x2a   : > { %s1012_s2 = sshll.u32 (!%p992_p3), %s1009_s28, 3  ;;  %s245_s8 = scalar_lea.sflag (!%p992_p3), [#allocation8], %s1009_s28 }
  0x2b   : > { %s248_s10 = scalar_lea.vmem (!%p992_p3), [#allocation7], %s1012_s2 }
  0x2d   : > { %840 = dma.done.wait (%p959_p8), %s245_s8, 128  }
  0x2e   : > { %842 = vsyncadd (%p959_p8), %s245_s8, 4294967168  ;;  %s254_s0 = sand.u32 1, %s939_s24   ;;  %s258_s6 = scalar_lea.vmem [#allocation10], %s1012_s2 }
  0x2f   : > { %s255_s26 = scalar_lea.sflag [#allocation11], %s254_s0 }
  0x30   : > { %844 = dma.done.wait (%p959_p8), %s255_s26, 256  }
  0x31   : > { %846 = vsyncadd (%p959_p8), %s255_s26, 4294967040  ;;  %vm306_vm0 = vcmask 7168   ;;  %s311_s9 = sld [smem:[#allocation6 + %s865_s22]]  ;;  %v876_v0 = vmov -inf   ;;  %vm309_vm1 = vcmask 261120   ;;  %v877_v1 = vmov 0.0  }
  0x32   : > { %307 = vst.msk [vmem:[#allocation2] sm:$0xff] %vm306_vm0, %v876_v0  ;;  %s268_s24 = scalar_lea.vmem [#allocation12], %s1012_s2  ;;  %s301_s30 = scalar_lea.vmem [#allocation13], %s1012_s2 }
  0x33   : > { %308 = vst.msk [vmem:[#allocation3] sm:$0xff] %vm306_vm0, %v877_v1 }
  0x34   : > { %310 = vst.msk [vmem:[#allocation4] sm:$0xff] %vm309_vm1, %v877_v1 }
  0x37   : > { %p589_p4 = scmp.gt.s32.totalorder %s311_s9, 0  ;;  %p314_p5 = scmp.le.s32.totalorder %s311_s9, 0 }
  0x39   : > { %p315_p6 = por %p589_p4, %p314_p5 }
  0x3a   : > { %v321_v2 = vld [vmem:[%s258_s6] sm:$0xff] (%p315_p6)  ;;  %v319_v3 = vld [vmem:[%s248_s10] sm:$0xff] (%p315_p6)  ;;  %v350_v5 = vlaneseq (%p315_p6)  ;;  %v354_v7 = vstv (%p315_p6), %s311_s9  ;;  %vm358_vm3 = vcmask (%p315_p6), 64512   ;;  %v878_v11 = vmov (%p315_p6), 0  }
  0x3b   : > { %318 = sbr.rel (!%p315_p6) target bundleno = 563 (0x233), region = 52  ;;  %590 = vmatpush.xpose.msk.msra.mxu0 (%p315_p6), %vm309_vm1, %v321_v2  ;;  %v320_v4 = vmul.f32 (%p315_p6), 0.17677669, %v319_v3  ;;  %674 = vset.pattern.permute.xlu0 (%p315_p6), %v878_v11  ;;  %v357_v12 = vld [vmem:[#allocation2] sm:$0xff] (%p315_p6)  ;;  %v374_v25 = vld [vmem:[#allocation3] sm:$0xff] (%p315_p6)  ;;  %v382_v29 = vld [vmem:[#allocation4] sm:$0xff] (%p315_p6) }
  0x3c   : > { %v351_v6 = vand.u32 (%p315_p6), 127, %v350_v5  ;;  %675 = vset.pattern.permute.xlu1 (%p315_p6), %v878_v11  ;;  %v322_v18 = vld [vmem:[%s268_s24] sm:$0xff] (%p315_p6) }
  0x3d   : > { %407 = vmatpush.msra.mxu1 (%p315_p6), %v322_v18 }
  0x3e   : > { %591 = vmatmul.msk.f32.vlgmr.msra.gmra.mxu0 (%p315_p6), %vm309_vm1, %v320_v4  ;;  %vm355_vm2 = vcmp.lt.s32.totalorder (%p315_p6), %v351_v6, %v354_v7 }
  0xbb   : > { %v347_v8 = vpop.f32.mrf.mxu0 }
  0xbc   : > { %v356_v9 = vsel %vm355_vm2, %v347_v8, -1000000.0 }
  0xbd   : > { %v359_v10 = vsel %vm358_vm3, %v356_v9, -inf }
  0xbe   : > { %360 = vmax.xlane.f32.xlu0 %v359_v10 }
 0x131   : > { %v361_v13 = vpop.xlane.xlu0 %360 }
 0x132   : > { %v362_v14 = vmax.f32 %v357_v12, %v361_v13 }
 0x134   : > { %v363_v15 = vsub.f32 %v357_v12, %v362_v14  ;;  %414 = vst.msk [vmem:[#allocation2] sm:$0xff] %vm306_vm0, %v362_v14  ;;  %368 = vperm.xlu0 %674, %v362_v14  }
 0x136   : > { %v364_v16 = vmul.f32 1.442695, %v363_v15 }
 0x138   : > { %676 = vpow2.f32 %v364_v16 }
 0x13e   : > { %v677_v17 = vpop.eup %676 }
 0x13f   : > { %385 = vperm.xlu1 %675, %v677_v17   ;;  %v375_v26 = vmul.f32 %v677_v17, %v374_v25 }
 0x1a6   : > { %v369_v19 = vpop.permute.xlu0 %368 }
 0x1a7   : > { %v371_v20 = vsub.f32 %v356_v9, %v369_v19 }
 0x1a9   : > { %v372_v21 = vmul.f32 1.442695, %v371_v20 }
 0x1ab   : > { %678 = vpow2.f32 %v372_v21 }
 0x1b1   : > { %v679_v22 = vpop.eup %678  ;;  %v386_v24 = vpop.permute.xlu1 %385 }
 0x1b2   : > { %592 = vmatmul.msk.f32.vlgmr.msra.gmra.mxu1 %vm358_vm3, %v679_v22  ;;  %v376_v23 = vsel %vm358_vm3, %v679_v22, 0.0  ;;  %v388_v30 = vmul.f32 %v386_v24, %v382_v29 }
 0x1b3   : > { %377 = vadd.xlane.f32.xlu1 %v376_v23 }
 0x226   : > { %v378_v27 = vpop.xlane.xlu1 %377 }
 0x227   : > { %v379_v28 = vadd.f32 %v378_v27, %v375_v26 }
 0x229   : > { %381 = vst.msk [vmem:[#allocation3] sm:$0xff] %vm306_vm0, %v379_v28 }
 0x22f   : > { %v409_v31 = vpop.f32.mrf.mxu1 }
 0x230   : > { %v412_v32 = vadd.f32 %v409_v31, %v388_v30 }
 0x232   : > { %413 = vst.msk [vmem:[#allocation4] sm:$0xff] %vm309_vm1, %v412_v32 }
 0x233 PF: > { %v418_v33 = vld [vmem:[#allocation3] sm:$0xff]  ;;  %v879_v34 = vmov 0   ;;  %s594_s11 = sshll.u32 %s865_s22, 3  ;;  %s443_s13 = sshll.u32 %s301_s30, 4  ;;  %s444_s13 = int_to_ptr.vmem [resolvable:$true] %s443_s13 }
 0x234   : > { %680 = vset.pattern.permute.xlu0 %v879_v34  ;;  %681 = vrcp.f32 %v418_v33  ;;  %s441_s29 = scalar_lea.hbm %s1087_s4, %s594_s11  ;;  %s430_s15 = scalar_lea.sflag [#allocation9], %s1009_s28 }
 0x235   : > { %s445_s14 = sshll.u32 %s441_s29, 4  ;;  %s805_s18 = scalar_lea.hbm %s1087_s4, 16  ;;  %s446_s14 = int_to_ptr.hbm [resolvable:$true] %s445_s14 }
 0x236   : > { %s799_s17 = sshra.s32 %s446_s14, 4  ;;  %s800_s17 = int_to_ptr.hbm [resolvable:$true] %s799_s17 }
 0x237   : > { %s801_s12 = scalar_lea.hbm %s800_s17, 8  ;;  %p806_p13 = scmp.lt.s32.totalorder %s800_s17, %s1087_s4 }
 0x238   : > { %p802_p7 = scmp.ne.s32.totalorder %s800_s17, %s801_s12  ;;  %p807_p0 = scmp.lt.s32.totalorder %s805_s18, %s801_s12 }
 0x239   : > { %v420_v36 = vld [vmem:[#allocation4] sm:$0xff] }
 0x23a   : > { %v682_v35 = vpop.eup %681  ;;  %p803_p8 = pnand %p802_p7, %p963_p9  ;;  %p808_p1 = por %p807_p0, %p806_p13 }
 0x23b   : > { %423 = vperm.xlu0 %680, %v682_v35  }
 0x23c   : > { %p804_p10 = pneg %p803_p8 }
 0x23e   : > { %p809_p2 = pnand %p808_p1, %p804_p10 }
 0x2ad   : > { %v424_v37 = vpop.permute.xlu0 %423 }
 0x2ae   : > { %v426_v38 = vmul.f32 %v424_v37, %v420_v36 }
 0x2b0   : > { %428 = vst.msk [vmem:[%s301_s30] sm:$0xff] %vm309_vm1, %v426_v38 }
 0x2b1   : > { %812 = shalt.err (!%p809_p2)
}
 0x2b2   : > { %603 = dma.vmem_to_hbm [thread:$0]  (%p963_p9), %s444_s13, 128, %s446_s14, %s430_s15  }
 0x2b3 PF: > { %s457_s28 = sand.u32 1, %s853_s19   ;;  %p616_p3 = pnand %p577_p12, %p970_p11 }
 0x2b4   : > { %s458_s2 = scalar_lea.sflag [#allocation9], %s457_s28 }
 0x2b5   : > { %p617_p4 = pneg %p616_p3 }
 0x2b7   : > { %848 = dma.done.wait (%p617_p4), %s458_s2, 128  }
 0x2b8   : > { %850 = vsyncadd (%p617_p4), %s458_s2, 4294967168  ;;  %s31_s23 = sadd.s32 1, %s873_s23   ;;  %s1101_s0 = sld [smem:[#allocation20_spill]] }
 0x2b9   : > { %p28_p5 = scmp.ge.s32.totalorder %s31_s23, 4   ;;  %s1102_s22 = sld [smem:[#allocation18_spill]] }
 0x2ba   : > { %s1103_s5 = sld [smem:[#allocation19_spill]]  ;;  %s1104_s19 = smov %s857_s20 }
 0x2bb   : > { %s1105_s20 = smov %s861_s21 }
 0x2bc   :  { %30 = sbr.rel (!%p28_p5) target bundleno = 14 (0xe), region = 113 }
 0x2be   : > { %s1106_s21 = smov %s1101_s0 }
 0x2c0   : > { %s1107_s0 = smov %s1103_s5 }
 0x2c1   :  { %464 = vsyncpa [#allocation8], 1 }
 0x2c2   :  { %466 = vsyncpa [#allocation8 + $0x1], 1 }
 0x2c3   :  { %467 = vsyncpa [#allocation11], 1 }
 0x2c4   :  { %469 = vsyncpa [#allocation11 + $0x1], 1 }
 0x2c5   :  { %470 = vsyncpa [#allocation9], 1 }
 0x2c6   :  { %472 = vsyncpa [#allocation9 + $0x1], 1 }

</bundles_post_ra>
